<compile_context>
chip_gen: v7x
topology: tpu7x:2x2x1
jax: 0.10.0
libtpu: 0.0.40
codegen_flags: <defaults>
</compile_context>

<pallas_src>
import jax
import jax.numpy as jnp
from jax.experimental import pallas as pl
from jax.experimental.pallas import tpu as pltpu

EPS = 1e-5  # PyTorch BatchNorm2d default eps


# ----------------------------------------------------------------------------
# Tiling heuristics.
# ----------------------------------------------------------------------------
def _row_tiling(M, max_tile=512, min_split=64):
    """Pick (tm, mpad) with mpad = tm * steps >= M.

    Preferences: zero row padding (tm divides M) > >=2 grid steps (v7x megacore) >
    256-row alignment (v6e/v7x MXU) > larger tiles.  Multi-step tiles are multiples of
    16 rows (packed bf16 output); a single block equal to the full array needs no
    alignment at all.
    """
    if M % 16 == 0:
        best = None
        for tm in range(16, min(M, max_tile) + 1, 16):
            if M % tm == 0:
                score = (int(M // tm >= 2 and tm >= min_split), int(tm % 256 == 0), tm)
                if best is None or score > best[1]:
                    best = (tm, score)
        if best is not None and best[1][0]:
            return best[0], M                         # >= 2 unpadded steps
    if M <= 256:
        return M, M                                   # tiny: one full-M block, no pad
    # Minimal 16-aligned padding with >= 2 steps and tiles <= max_tile.
    steps = max(2, -(-M // max_tile))
    tm = ((-(-M // steps) + 15) // 16) * 16
    return tm, tm * steps


def _col_tiling(Cout, max_single=1024):
    """Lane-dense output tiles.  Small Cout: one 128-aligned block.  Large Cout: 512-lane
    (256-aligned for the v6e/v7x MXU) tiles so the weight block stays a few MiB."""
    coutp = ((Cout + 127) // 128) * 128
    if coutp <= max_single:
        return coutp, coutp
    tn = 512
    return tn, ((Cout + tn - 1) // tn) * tn


def _vmem_limit_bytes(tm, K, tn):
    """Scoped-VMEM request sized from the actual double-buffered tile footprint."""
    per_buf = tm * K * 4 + K * tn * 2 + 8 * tn * 4 + tm * tn * 2   # X(f32)+W(bf16)+shift+out(bf16)
    want = 4 * per_buf + (4 << 20)                                  # 2x buffering, 2x slack, +4 MiB
    try:
        cap = int(pltpu.get_tpu_info().vmem_capacity_bytes)
    except Exception:
        cap = 64 << 20                                              # conservative (v7x per-TC)
    return int(min(max(want, 16 << 20), cap - (8 << 20)))


# ----------------------------------------------------------------------------
# Fused Pallas kernel: relu( bf16(X) @ W + shift ), bf16 writeback.
# ----------------------------------------------------------------------------
def _conv_bn_relu_kernel(x_ref, w_ref, shift_ref, o_ref):
    x = x_ref[...].astype(jnp.bfloat16)            # f32 HBM read, bf16 at the MXU boundary
    y = jnp.dot(x, w_ref[...], preferred_element_type=jnp.float32)
    y = jnp.maximum(y + shift_ref[...], 0.0)       # f32 bias + ReLU epilogue
    o_ref[...] = y.astype(o_ref.dtype)             # bf16 store: halves writeback bytes


def fused_conv1x1_bn_relu(x2d, w2d, shift):
    """x2d: (M, Cin) f32, w2d: (Cin, Cout) f32 with BN scale folded in, shift: (Cout,) f32.
    Returns relu(x2d @ w2d + shift) as an (M, Cout) bf16 array."""
    M, K = x2d.shape
    Cout = w2d.shape[1]

    tm, mpad = _row_tiling(M)
    tn, coutp = _col_tiling(Cout)
    n_i, n_j = mpad // tm, coutp // tn

    xp = x2d if mpad == M else jnp.pad(x2d, ((0, mpad - M), (0, 0)))
    xp = xp.astype(jnp.float32)                    # cast to bf16 happens inside the kernel
    wp = w2d if coutp == Cout else jnp.pad(w2d, ((0, 0), (0, coutp - Cout)))
    wp = wp.astype(jnp.bfloat16)
    sp = shift if coutp == Cout else jnp.pad(shift, (0, coutp - Cout))
    sp = sp.reshape(1, coutp).astype(jnp.float32)

    cost = pl.CostEstimate(
        flops=2 * mpad * K * coutp,
        transcendentals=0,
        bytes_accessed=mpad * K * 4 + K * coutp * 2 + coutp * 4 + mpad * coutp * 2,
    )

    out = pl.pallas_call(
        _conv_bn_relu_kernel,
        out_shape=jax.ShapeDtypeStruct((mpad, coutp), jnp.bfloat16),
        grid_spec=pltpu.PrefetchScalarGridSpec(
            num_scalar_prefetch=0,
            grid=(n_i, n_j),                                        # rows outer, cols inner
            in_specs=[
                pl.BlockSpec((tm, K), lambda i, j: (i, 0)),         # X tile (resident across j)
                pl.BlockSpec((K, tn), lambda i, j: (0, j)),         # folded weight column tile
                pl.BlockSpec((1, tn), lambda i, j: (0, j)),         # fused BN/bias shift
            ],
            out_specs=pl.BlockSpec((tm, tn), lambda i, j: (i, j)),
        ),
        compiler_params=pltpu.CompilerParams(
            dimension_semantics=("parallel", "parallel"),
            vmem_limit_bytes=_vmem_limit_bytes(tm, K, tn),
        ),
        cost_estimate=cost,
    )(xp, wp, sp)

    if mpad != M or coutp != Cout:
        out = out[:M, :Cout]
    return out


# ----------------------------------------------------------------------------
# conv_bn_relu forward (matches nn.Conv2d(k=1, stride, padding, bias=True) + BN + ReLU).
# ----------------------------------------------------------------------------
def conv_bn_relu_forward(params, x_nchw, stride=1, padding=1):
    x = jnp.transpose(x_nchw, (0, 2, 3, 1)).astype(jnp.float32)          # NCHW -> NHWC
    if padding > 0:
        x = jnp.pad(x, ((0, 0), (padding, padding), (padding, padding), (0, 0)))
    if stride > 1:
        x = x[:, ::stride, ::stride, :]                                   # k=1 conv: pure subsample
    N, Ho, Wo, Cin = x.shape
    Cout = params["w"].shape[-1]

    # Fold inference-mode BN into the 1x1 conv: scale into W columns, shift as a bias.
    scale = params["gamma"] / jnp.sqrt(params["var"] + EPS)
    w_folded = params["w"].reshape(Cin, Cout) * scale[None, :]
    shift = (params["b"] - params["mean"]) * scale + params["beta"]

    y = fused_conv1x1_bn_relu(x.reshape(-1, Cin), w_folded, shift)
    # NCHW f32 result to match the PyTorch module's output layout/dtype.
    return jnp.transpose(y.reshape(N, Ho, Wo, Cout), (0, 3, 1, 2)).astype(jnp.float32)


# Pure-JAX f32 reference (unfolded BN) for correctness checking.
def conv_bn_relu_reference(params, x_nchw, stride=1, padding=1):
    x = jnp.transpose(x_nchw, (0, 2, 3, 1)).astype(jnp.float32)
    if padding > 0:
        x = jnp.pad(x, ((0, 0), (padding, padding), (padding, padding), (0, 0)))
    if stride > 1:
        x = x[:, ::stride, ::stride, :]
    y = jnp.einsum("nhwc,cd->nhwd", x, params["w"]) + params["b"]
    y = (y - params["mean"]) / jnp.sqrt(params["var"] + EPS) * params["gamma"] + params["beta"]
    y = jnp.maximum(y, 0.0)
    return jnp.transpose(y, (0, 3, 1, 2))


# ----------------------------------------------------------------------------
# Deterministic synthetic parameters.
# ----------------------------------------------------------------------------
def make_params(key, in_ch, out_ch):
    ks = jax.random.split(key, 6)
    return {
        "w": jax.random.normal(ks[0], (in_ch, out_ch), jnp.float32) / (in_ch ** 0.5),
        "b": 0.1 * jax.random.normal(ks[1], (out_ch,), jnp.float32),
        "gamma": jax.random.uniform(ks[2], (out_ch,), jnp.float32, minval=0.5, maxval=1.5),
        "beta": 0.1 * jax.random.normal(ks[3], (out_ch,), jnp.float32),
        "mean": 0.1 * jax.random.normal(ks[4], (out_ch,), jnp.float32),
        "var": jax.random.uniform(ks[5], (out_ch,), jnp.float32, minval=0.5, maxval=1.5),
    }


if __name__ == "__main__":
    key = jax.random.PRNGKey(0)
    kx, kp = jax.random.split(key)
    in_ch, out_ch = 4, 16
    x = jax.random.normal(kx, (2, in_ch, 16, 16), jnp.float32)
    params = make_params(kp, in_ch, out_ch)

    fwd = jax.jit(conv_bn_relu_forward, static_argnames=("stride", "padding"))

    # Default module config: kernel_size=1, stride=1, padding=1  ->  (N, Cout, H+2, W+2)
    out = jax.block_until_ready(fwd(params, x, stride=1, padding=1))
    assert out.shape == (2, out_ch, 18, 18), out.shape
    assert bool(jnp.all(jnp.isfinite(out)))
    ref = conv_bn_relu_reference(params, x, stride=1, padding=1)
    assert bool(jnp.allclose(out, ref, atol=3e-2, rtol=3e-2)), float(jnp.max(jnp.abs(out - ref)))

    # Strided config: stride=2, padding=1  ->  (N, Cout, 9, 9)
    out2 = jax.block_until_ready(fwd(params, x, stride=2, padding=1))
    assert out2.shape == (2, out_ch, 9, 9), out2.shape
    ref2 = conv_bn_relu_reference(params, x, stride=2, padding=1)
    assert bool(jnp.allclose(out2, ref2, atol=3e-2, rtol=3e-2))

    print("KERNEL_OK")
</pallas_src>

<mosaic_0001>
module attributes {stable_mosaic.version = 11 : i64} {
  func.func @_conv_bn_relu_kernel(%arg0: i32, %arg1: i32, %arg2: memref<336x4xf32, #tpu.memory_space<vmem>>, %arg3: memref<4x128xbf16, #tpu.memory_space<vmem>>, %arg4: memref<1x128xf32, #tpu.memory_space<vmem>>, %arg5: memref<336x128xbf16, #tpu.memory_space<vmem>>) attributes {dimension_semantics = [#tpu.dimension_semantics<parallel>, #tpu.dimension_semantics<parallel>], iteration_bounds = array<i64: 2, 1>, scalar_prefetch = 0 : i64, scratch_operands = 0 : i64, tpu.core_type = #tpu.core_type<tc>, window_params = [{transform_indices = @transform_0, window_bounds = array<i64: 336, 4>}, {transform_indices = @transform_1, window_bounds = array<i64: 4, 128>}, {transform_indices = @transform_2, window_bounds = array<i64: 1, 128>}, {transform_indices = @transform_3, window_bounds = array<i64: 336, 128>}]} {
    %c0 = arith.constant 0 : index
    %c0_0 = arith.constant 0 : index
    %0 = vector.load %arg2[%c0, %c0_0] : memref<336x4xf32, #tpu.memory_space<vmem>>, vector<336x4xf32>
    %1 = arith.truncf %0 : vector<336x4xf32> to vector<336x4xbf16>
    %c0_1 = arith.constant 0 : index
    %c0_2 = arith.constant 0 : index
    %2 = vector.load %arg3[%c0_1, %c0_2] : memref<4x128xbf16, #tpu.memory_space<vmem>>, vector<4x128xbf16>
    %cst = arith.constant dense<0.000000e+00> : vector<336x128xf32>
    %3 = tpu.matmul %1, %2, %cst {dimension_numbers = #tpu.dot_dimension_numbers<[1], [0], [0], [1], [0, 0, 1, 1], [], []>} : vector<336x4xbf16>, vector<4x128xbf16>, vector<336x128xf32> -> vector<336x128xf32>
    %c0_3 = arith.constant 0 : index
    %c0_4 = arith.constant 0 : index
    %4 = vector.load %arg4[%c0_3, %c0_4] : memref<1x128xf32, #tpu.memory_space<vmem>>, vector<1x128xf32>
    %5 = vector.broadcast %4 : vector<1x128xf32> to vector<336x128xf32>
    %6 = arith.addf %3, %5 : vector<336x128xf32>
    %cst_5 = arith.constant 0.000000e+00 : f32
    %7 = vector.broadcast %cst_5 : f32 to vector<336x128xf32>
    %8 = arith.maximumf %6, %7 : vector<336x128xf32>
    %9 = arith.truncf %8 : vector<336x128xf32> to vector<336x128xbf16>
    %c0_6 = arith.constant 0 : index
    %c0_7 = arith.constant 0 : index
    %10 = vector.load %arg5[%c0_6, %c0_7] : memref<336x128xbf16, #tpu.memory_space<vmem>>, vector<336x128xbf16>
    tpu.vector_store %arg5[%c0_6, %c0_7], %9 {strides = array<i32>} : memref<336x128xbf16, #tpu.memory_space<vmem>>, vector<336x128xbf16>,
    return
  }
  func.func @transform_0(%arg0: i32, %arg1: i32) -> (i32, i32) {
    %c0_i32 = arith.constant 0 : i32
    %c0_i32_0 = arith.constant 0 : i32
    return %arg0, %c0_i32 : i32, i32
  }
  func.func @transform_1(%arg0: i32, %arg1: i32) -> (i32, i32) {
    %c0_i32 = arith.constant 0 : i32
    %c0_i32_0 = arith.constant 0 : i32
    return %c0_i32, %arg1 : i32, i32
  }
  func.func @transform_2(%arg0: i32, %arg1: i32) -> (i32, i32) {
    %c0_i32 = arith.constant 0 : i32
    %c0_i32_0 = arith.constant 0 : i32
    return %c0_i32, %arg1 : i32, i32
  }
  func.func @transform_3(%arg0: i32, %arg1: i32) -> (i32, i32) {
    %c0_i32 = arith.constant 0 : i32
    return %arg0, %arg1 : i32, i32
  }
}

</mosaic_0001>

<bundles_post_ra>
// kernel: conv_bn_relu_forward.1
= control target key start
LH: loop header
LB: loop body
LE: loop exit
PB: predicated region body
PF: predicated region fallthrough
CT: control target
= control target key end

     0   :  { %s1344_s12 = smov 0   ;;  %s1346_s13 = smov 0   ;;  %s1563_s0 = inlined_call_operand.vmem [shape: f32[672,4], index: 0, kind: input, shape index: {}]   ;;  %s1564_s1 = inlined_call_operand.vmem [shape: bf16[4,128], index: 1, kind: input, shape index: {}]   ;;  %s1565_s2 = inlined_call_operand.vmem [shape: f32[1,128], index: 2, kind: input, shape index: {}]   ;;  %s1566_s3 = inlined_call_operand.vmem [shape: bf16[672,128], index: 3, kind: output, shape index: {}]  }
   0x1   :  { %s1348_s14 = smov 0  }
   0x2 LB: > { %s25_s15 = sadd.s32 1, %s1316_s13  ;;  %p926_p0 = scmp.ge.s32.totalorder %s1320_s14, 1  ;;  %s1320_s14 = sphi %s1348_s14, %s13_s14   ;;  %s1316_s13 = sphi %s1346_s13, %s1568_s13   ;;  %s1312_s12 = sphi %s1344_s12, %s1567_s12  }
   0x3   : > { %p27_p1 = scmp.ge.s32.totalorder %s25_s15, 2  ;;  %p169_p2 = scmp.lt.s32.totalorder %s1320_s14, 3 }
   0x5   : > { %s1570_s15 = smov (%p27_p1, %s25_s15), 0  ;;  %p170_p3 = pnand %p926_p0, %p169_p2 }
   0x6   : > { %v289_v0 = vld [vmem:[%s1564_s1] sm:$0x3] (!%p170_p3)  ;;  %vm361_vm0 = vcmask (!%p170_p3), 1041408   ;;  %s203_s18 = smul.u32 (!%p170_p3), 42, %s1312_s12  ;;  %v1322_v1 = vmov (!%p170_p3), 0.0   ;;  %vm1323_vm1 = vmmov (!%p170_p3), 0  }
   0x7   : > { %173 = sbr.rel (%p170_p3) target bundleno = 321 (0x141), region = 32  ;;  %1184 = vmatprep.subr.bf16.mxu0 (!%p170_p3), %v1322_v1  ;;  %v363_v2 = vsel (!%p170_p3), %vm361_vm0, %v289_v0, 0  ;;  %1186 = vmatprep.mubr.msk.bf16.mxu0 (!%p170_p3), %vm1323_vm1, %v1322_v1  ;;  %vm297_vm2 = vcmask (!%p170_p3), 31744  }
   0x8   : > { %1185 = vmatpush3.bf16.msra.mxu0 (!%p170_p3), %v363_v2  ;;  %p204_p4 = scmp.lt.s32.totalorder (!%p170_p3), %s203_s18, 83  ;;  %1270 = vmatprep.subr.bf16.mxu1 (!%p170_p3), %v1322_v1 }
   0x9   : > { %1271 = vmatpush3.bf16.msra.mxu1 (!%p170_p3), %v363_v2  ;;  %1230 = vmatprep.mubr.msk.bf16.mxu1 (!%p170_p3), %vm1323_vm1, %v1322_v1 }
   0xe   : > { %s1572_s18 = smov (!%p204_p4, %s203_s18), 83 }
   0xf   : > { %s927_s19 = sshll.u32 %s1572_s18, 3  ;;  %s928_s25 = sshll.u32 %s1572_s18, 2 }
  0x10   : > { %s1377_s22 = scalar_lea.vmem %s1563_s0, %s927_s19  ;;  %s1493_s28 = scalar_lea.vmem %s1566_s3, %s928_s25 }
  0x11   : > { %v226_v3 = vld [vmem:[%s1377_s22] sm:$0xff]  ;;  %v227_v4 = vld [vmem:[%s1377_s22 + $0x8] sm:$0xff]  ;;  %v248_v5 = vld [vmem:[%s1377_s22 + $0xb0] sm:$0xff] }
  0x12   : > { %v268_v6 = vpack.c.bf16 %v227_v4, %v226_v3  ;;  %v249_v7 = vld [vmem:[%s1377_s22 + $0xb8] sm:$0xff]  ;;  %v228_v9 = vld [vmem:[%s1377_s22 + $0x10] sm:$0xff]  ;;  %v250_v11 = vld [vmem:[%s1377_s22 + $0xc0] sm:$0xff] }
  0x13   : > { %v279_v8 = vpack.c.bf16 %v249_v7, %v248_v5  ;;  %v229_v10 = vld [vmem:[%s1377_s22 + $0x18] sm:$0xff]  ;;  %v251_v12 = vld [vmem:[%s1377_s22 + $0xc8] sm:$0xff]  ;;  %v230_v15 = vld [vmem:[%s1377_s22 + $0x20] sm:$0xff] }
  0x14   : > { %1187 = vmatmul.mubr.msk.bf16.vlgmr.msra.gmra.mrb[0].mxu0 %vm297_vm2, %v268_v6  ;;  %v269_v13 = vpack.c.bf16 %v229_v10, %v228_v9  ;;  %v280_v14 = vpack.c.bf16 %v251_v12, %v250_v11  ;;  %v231_v16 = vld [vmem:[%s1377_s22 + $0x28] sm:$0xff]  ;;  %v252_v17 = vld [vmem:[%s1377_s22 + $0xd0] sm:$0xff]  ;;  %v253_v18 = vld [vmem:[%s1377_s22 + $0xd8] sm:$0xff] }
  0x15   : > { %1231 = vmatmul.mubr.msk.bf16.vlgmr.msra.gmra.mrb[0].mxu1 %vm297_vm2, %v279_v8  ;;  %1190 = vmatprep.mubr.msk.bf16.mxu0 %vm1323_vm1, %v1322_v1  ;;  %v270_v19 = vpack.c.bf16 %v231_v16, %v230_v15  ;;  %v281_v20 = vpack.c.bf16 %v253_v18, %v252_v17  ;;  %v232_v21 = vld [vmem:[%s1377_s22 + $0x30] sm:$0xff]  ;;  %v233_v22 = vld [vmem:[%s1377_s22 + $0x38] sm:$0xff]  ;;  %v254_v23 = vld [vmem:[%s1377_s22 + $0xe0] sm:$0xff] }
  0x16   : > { %1234 = vmatprep.mubr.msk.bf16.mxu1 %vm1323_vm1, %v1322_v1  ;;  %v255_v24 = vld [vmem:[%s1377_s22 + $0xe8] sm:$0xff]  ;;  %v271_v25 = vpack.c.bf16 %v233_v22, %v232_v21  ;;  %v234_v27 = vld [vmem:[%s1377_s22 + $0x40] sm:$0xff]  ;;  %v256_v29 = vld [vmem:[%s1377_s22 + $0xf0] sm:$0xff] }
  0x17   : > { %v282_v26 = vpack.c.bf16 %v255_v24, %v254_v23  ;;  %v235_v28 = vld [vmem:[%s1377_s22 + $0x48] sm:$0xff]  ;;  %v257_v30 = vld [vmem:[%s1377_s22 + $0xf8] sm:$0xff]  ;;  %v236_v33 = vld [vmem:[%s1377_s22 + $0x50] sm:$0xff] }
  0x18   : > { %v272_v31 = vpack.c.bf16 %v235_v28, %v234_v27  ;;  %v283_v32 = vpack.c.bf16 %v257_v30, %v256_v29  ;;  %v237_v34 = vld [vmem:[%s1377_s22 + $0x58] sm:$0xff]  ;;  %v258_v35 = vld [vmem:[%s1377_s22 + $0x100] sm:$0xff]  ;;  %v259_v36 = vld [vmem:[%s1377_s22 + $0x108] sm:$0xff] }
  0x19   : > { %v273_v37 = vpack.c.bf16 %v237_v34, %v236_v33  ;;  %v284_v38 = vpack.c.bf16 %v259_v36, %v258_v35  ;;  %v238_v39 = vld [vmem:[%s1377_s22 + $0x60] sm:$0xff]  ;;  %v239_v40 = vld [vmem:[%s1377_s22 + $0x68] sm:$0xff]  ;;  %v260_v41 = vld [vmem:[%s1377_s22 + $0x110] sm:$0xff] }
  0x1a   : > { %v261_v42 = vld [vmem:[%s1377_s22 + $0x118] sm:$0xff]  ;;  %v274_v43 = vpack.c.bf16 %v239_v40, %v238_v39  ;;  %v240_v45 = vld [vmem:[%s1377_s22 + $0x70] sm:$0xff]  ;;  %v262_v47 = vld [vmem:[%s1377_s22 + $0x120] sm:$0xff] }
  0x1b   : > { %v285_v44 = vpack.c.bf16 %v261_v42, %v260_v41  ;;  %v241_v46 = vld [vmem:[%s1377_s22 + $0x78] sm:$0xff]  ;;  %v263_v48 = vld [vmem:[%s1377_s22 + $0x128] sm:$0xff]  ;;  %v242_v51 = vld [vmem:[%s1377_s22 + $0x80] sm:$0xff] }
  0x1c   : > { %1191 = vmatmul.mubr.msk.bf16.gmra.mrb[4].mxu0 %vm297_vm2, %v269_v13  ;;  %v275_v49 = vpack.c.bf16 %v241_v46, %v240_v45  ;;  %v286_v50 = vpack.c.bf16 %v263_v48, %v262_v47  ;;  %v243_v52 = vld [vmem:[%s1377_s22 + $0x88] sm:$0xff]  ;;  %v264_v53 = vld [vmem:[%s1377_s22 + $0x130] sm:$0xff]  ;;  %v265_v54 = vld [vmem:[%s1377_s22 + $0x138] sm:$0xff] }
  0x1d   : > { %1235 = vmatmul.mubr.msk.bf16.gmra.mrb[4].mxu1 %vm297_vm2, %v280_v14  ;;  %1194 = vmatprep.mubr.msk.bf16.mxu0 %vm1323_vm1, %v1322_v1  ;;  %v276_v55 = vpack.c.bf16 %v243_v52, %v242_v51  ;;  %v287_v56 = vpack.c.bf16 %v265_v54, %v264_v53  ;;  %v244_v57 = vld [vmem:[%s1377_s22 + $0x90] sm:$0xff]  ;;  %v245_v58 = vld [vmem:[%s1377_s22 + $0x98] sm:$0xff]  ;;  %v266_v59 = vld [vmem:[%s1377_s22 + $0x140] sm:$0xff] }
  0x1e   : > { %1238 = vmatprep.mubr.msk.bf16.mxu1 %vm1323_vm1, %v1322_v1  ;;  %v267_v60 = vld [vmem:[%s1377_s22 + $0x148] sm:$0xff]  ;;  %v277_v61 = vpack.c.bf16 %v245_v58, %v244_v57  ;;  %v246_v63 = vld [vmem:[%s1377_s22 + $0xa0] sm:$0xff] }
  0x1f   : > { %v288_v62 = vpack.c.bf16 %v267_v60, %v266_v59  ;;  %v247_v0 = vld [vmem:[%s1377_s22 + $0xa8] sm:$0xff]  ;;  %v1483_v3 = vld [vmem:[%s1565_s2] ss:$0 sm:$0xff] }
  0x20   : > { %v278_v2 = vpack.c.bf16 %v247_v0, %v246_v63 }
  0x24   : > { %1195 = vmatmul.mubr.msk.bf16.gmra.mrb[8].mxu0 %vm297_vm2, %v270_v19 }
  0x25   : > { %1239 = vmatmul.mubr.msk.bf16.gmra.mrb[8].mxu1 %vm297_vm2, %v281_v20  ;;  %1198 = vmatprep.mubr.msk.bf16.mxu0 %vm1323_vm1, %v1322_v1 }
  0x26   : > { %1242 = vmatprep.mubr.msk.bf16.mxu1 %vm1323_vm1, %v1322_v1 }
  0x2c   : > { %1199 = vmatmul.mubr.msk.bf16.gmra.mrb[12].mxu0 %vm297_vm2, %v271_v25 }
  0x2d   : > { %1243 = vmatmul.mubr.msk.bf16.gmra.mrb[12].mxu1 %vm297_vm2, %v282_v26  ;;  %1202 = vmatprep.mubr.msk.bf16.mxu0 %vm1323_vm1, %v1322_v1 }
  0x2e   : > { %1246 = vmatprep.mubr.msk.bf16.mxu1 %vm1323_vm1, %v1322_v1 }
  0x34   : > { %1203 = vmatmul.mubr.msk.bf16.gmra.mrb[16].mxu0 %vm297_vm2, %v272_v31 }
  0x35   : > { %1247 = vmatmul.mubr.msk.bf16.gmra.mrb[16].mxu1 %vm297_vm2, %v283_v32  ;;  %1206 = vmatprep.mubr.msk.bf16.mxu0 %vm1323_vm1, %v1322_v1 }
  0x36   : > { %1250 = vmatprep.mubr.msk.bf16.mxu1 %vm1323_vm1, %v1322_v1 }
  0x3c   : > { %1207 = vmatmul.mubr.msk.bf16.gmra.mrb[20].mxu0 %vm297_vm2, %v273_v37 }
  0x3d   : > { %1251 = vmatmul.mubr.msk.bf16.gmra.mrb[20].mxu1 %vm297_vm2, %v284_v38  ;;  %1210 = vmatprep.mubr.msk.bf16.mxu0 %vm1323_vm1, %v1322_v1 }
  0x3e   : > { %1254 = vmatprep.mubr.msk.bf16.mxu1 %vm1323_vm1, %v1322_v1 }
  0x44   : > { %1211 = vmatmul.mubr.msk.bf16.gmra.mrb[24].mxu0 %vm297_vm2, %v274_v43 }
  0x45   : > { %1255 = vmatmul.mubr.msk.bf16.gmra.mrb[24].mxu1 %vm297_vm2, %v285_v44  ;;  %1214 = vmatprep.mubr.msk.bf16.mxu0 %vm1323_vm1, %v1322_v1 }
  0x46   : > { %1258 = vmatprep.mubr.msk.bf16.mxu1 %vm1323_vm1, %v1322_v1 }
  0x4c   : > { %1215 = vmatmul.mubr.msk.bf16.gmra.mrb[28].mxu0 %vm297_vm2, %v275_v49 }
  0x4d   : > { %1259 = vmatmul.mubr.msk.bf16.gmra.mrb[28].mxu1 %vm297_vm2, %v286_v50  ;;  %1218 = vmatprep.mubr.msk.bf16.mxu0 %vm1323_vm1, %v1322_v1 }
  0x4e   : > { %1262 = vmatprep.mubr.msk.bf16.mxu1 %vm1323_vm1, %v1322_v1 }
  0x54   : > { %1219 = vmatmul.mubr.msk.bf16.gmra.mrb[32].mxu0 %vm297_vm2, %v276_v55 }
  0x55   : > { %1263 = vmatmul.mubr.msk.bf16.gmra.mrb[32].mxu1 %vm297_vm2, %v287_v56  ;;  %1222 = vmatprep.mubr.msk.bf16.mxu0 %vm1323_vm1, %v1322_v1 }
  0x56   : > { %1266 = vmatprep.mubr.msk.bf16.mxu1 %vm1323_vm1, %v1322_v1 }
  0x5c   : > { %1223 = vmatmul.mubr.msk.bf16.gmra.mrb[36].mxu0 %vm297_vm2, %v277_v61 }
  0x5d   : > { %1267 = vmatmul.mubr.msk.bf16.gmra.mrb[36].mxu1 %vm297_vm2, %v288_v62  ;;  %1226 = vmatprep.mubr.msk.bf16.mxu0 %vm1323_vm1, %v1322_v1 }
  0x64   : > { %1227 = vmatmul.mubr.msk.bf16.gmra.mrb[40].mxu0 %vm297_vm2, %v278_v2 }
  0xe7   : > { %v399_v4 = vpop.f32.mrb[0].mxu0 }
  0xe8   : > { %v400_v5 = vadd.f32 %v1483_v3, %v399_v4  ;;  %v1188_v6 = vpop.f32.mrb[1].mxu0  ;;  %v487_v7 = vpop.f32.mrb[0].mxu1 }
  0xe9   : > { %v402_v8 = vpop.f32.mrb[2].mxu0  ;;  %v488_v9 = vadd.f32 %v1483_v3, %v487_v7  ;;  %v1232_v10 = vpop.f32.mrb[1].mxu1 }
  0xea   : > { %v403_v1 = vadd.f32 %v1483_v3, %v402_v8  ;;  %v1189_v11 = vpop.f32.mrb[3].mxu0  ;;  %v490_v12 = vpop.f32.mrb[2].mxu1  ;;  %v566_v16 = vmax.f32 %v400_v5, 0.0 }
  0xeb   : > { %v588_v13 = vmax.f32 %v488_v9, 0.0  ;;  %v491_v14 = vadd.f32 %v1483_v3, %v490_v12  ;;  %v1233_v15 = vpop.f32.mrb[3].mxu1 }
  0xec   : > { %v567_v17 = vmax.f32 %v403_v1, 0.0 }
  0xed   : > { %v589_v18 = vmax.f32 %v491_v14, 0.0 }
  0xee   : > { %v1040_v19 = vpack.c.bf16 %v567_v17, %v566_v16 }
  0xef   : > { %v1095_v20 = vpack.c.bf16 %v589_v18, %v588_v13  ;;  %v407_v21 = vpop.f32.mrb[4].mxu0 }
  0xf0   : > { %1041 = vst [vmem:[%s1493_s28] sm:$0xff] %v1040_v19   ;;  %v408_v22 = vadd.f32 %v1483_v3, %v407_v21  ;;  %v1192_v23 = vpop.f32.mrb[5].mxu0  ;;  %v495_v24 = vpop.f32.mrb[4].mxu1 }
  0xf1   : > { %1152 = vst [vmem:[%s1493_s28 + $0x58] sm:$0xff] %v1095_v20   ;;  %v410_v25 = vpop.f32.mrb[6].mxu0  ;;  %v496_v26 = vadd.f32 %v1483_v3, %v495_v24  ;;  %v1236_v27 = vpop.f32.mrb[5].mxu1 }
  0xf2   : > { %v411_v28 = vadd.f32 %v1483_v3, %v410_v25  ;;  %v1193_v29 = vpop.f32.mrb[7].mxu0  ;;  %v498_v30 = vpop.f32.mrb[6].mxu1  ;;  %v568_v34 = vmax.f32 %v408_v22, 0.0 }
  0xf3   : > { %v590_v31 = vmax.f32 %v496_v26, 0.0  ;;  %v499_v32 = vadd.f32 %v1483_v3, %v498_v30  ;;  %v1237_v33 = vpop.f32.mrb[7].mxu1 }
  0xf4   : > { %v569_v35 = vmax.f32 %v411_v28, 0.0 }
  0xf5   : > { %v591_v36 = vmax.f32 %v499_v32, 0.0 }
  0xf6   : > { %v1045_v37 = vpack.c.bf16 %v569_v35, %v568_v34 }
  0xf7   : > { %v1100_v38 = vpack.c.bf16 %v591_v36, %v590_v31  ;;  %v415_v39 = vpop.f32.mrb[8].mxu0 }
  0xf8   : > { %1142 = vst [vmem:[%s1493_s28 + $0x8] sm:$0xff] %v1045_v37   ;;  %v416_v40 = vadd.f32 %v1483_v3, %v415_v39  ;;  %v1196_v41 = vpop.f32.mrb[9].mxu0  ;;  %v503_v42 = vpop.f32.mrb[8].mxu1 }
  0xf9   : > { %1153 = vst [vmem:[%s1493_s28 + $0x60] sm:$0xff] %v1100_v38   ;;  %v418_v43 = vpop.f32.mrb[10].mxu0  ;;  %v504_v44 = vadd.f32 %v1483_v3, %v503_v42  ;;  %v1240_v45 = vpop.f32.mrb[9].mxu1 }
  0xfa   : > { %v419_v46 = vadd.f32 %v1483_v3, %v418_v43  ;;  %v1197_v47 = vpop.f32.mrb[11].mxu0  ;;  %v506_v48 = vpop.f32.mrb[10].mxu1  ;;  %v570_v52 = vmax.f32 %v416_v40, 0.0 }
  0xfb   : > { %v592_v49 = vmax.f32 %v504_v44, 0.0  ;;  %v507_v50 = vadd.f32 %v1483_v3, %v506_v48  ;;  %v1241_v51 = vpop.f32.mrb[11].mxu1 }
  0xfc   : > { %v571_v53 = vmax.f32 %v419_v46, 0.0 }
  0xfd   : > { %v593_v54 = vmax.f32 %v507_v50, 0.0 }
  0xfe   : > { %v1050_v55 = vpack.c.bf16 %v571_v53, %v570_v52 }
  0xff   : > { %v1105_v56 = vpack.c.bf16 %v593_v54, %v592_v49  ;;  %v423_v57 = vpop.f32.mrb[12].mxu0 }
 0x100   : > { %1143 = vst [vmem:[%s1493_s28 + $0x10] sm:$0xff] %v1050_v55   ;;  %v424_v58 = vadd.f32 %v1483_v3, %v423_v57  ;;  %v1200_v59 = vpop.f32.mrb[13].mxu0  ;;  %v511_v60 = vpop.f32.mrb[12].mxu1 }
 0x101   : > { %1154 = vst [vmem:[%s1493_s28 + $0x68] sm:$0xff] %v1105_v56   ;;  %v426_v61 = vpop.f32.mrb[14].mxu0  ;;  %v512_v62 = vadd.f32 %v1483_v3, %v511_v60  ;;  %v1244_v63 = vpop.f32.mrb[13].mxu1 }
 0x102   : > { %v427_v0 = vadd.f32 %v1483_v3, %v426_v61  ;;  %v1201_v2 = vpop.f32.mrb[15].mxu0  ;;  %v514_v4 = vpop.f32.mrb[14].mxu1  ;;  %v572_v8 = vmax.f32 %v424_v58, 0.0 }
 0x103   : > { %v594_v5 = vmax.f32 %v512_v62, 0.0  ;;  %v515_v6 = vadd.f32 %v1483_v3, %v514_v4  ;;  %v1245_v7 = vpop.f32.mrb[15].mxu1 }
 0x104   : > { %v573_v9 = vmax.f32 %v427_v0, 0.0 }
 0x105   : > { %v595_v10 = vmax.f32 %v515_v6, 0.0 }
 0x106   : > { %v1055_v1 = vpack.c.bf16 %v573_v9, %v572_v8 }
 0x107   : > { %v1110_v11 = vpack.c.bf16 %v595_v10, %v594_v5  ;;  %v431_v12 = vpop.f32.mrb[16].mxu0 }
 0x108   : > { %1144 = vst [vmem:[%s1493_s28 + $0x18] sm:$0xff] %v1055_v1   ;;  %v432_v13 = vadd.f32 %v1483_v3, %v431_v12  ;;  %v1204_v14 = vpop.f32.mrb[17].mxu0  ;;  %v519_v15 = vpop.f32.mrb[16].mxu1 }
 0x109   : > { %1155 = vst [vmem:[%s1493_s28 + $0x70] sm:$0xff] %v1110_v11   ;;  %v434_v16 = vpop.f32.mrb[18].mxu0  ;;  %v520_v17 = vadd.f32 %v1483_v3, %v519_v15  ;;  %v1248_v18 = vpop.f32.mrb[17].mxu1 }
 0x10a   : > { %v435_v19 = vadd.f32 %v1483_v3, %v434_v16  ;;  %v1205_v20 = vpop.f32.mrb[19].mxu0  ;;  %v522_v21 = vpop.f32.mrb[18].mxu1  ;;  %v574_v25 = vmax.f32 %v432_v13, 0.0 }
 0x10b   : > { %v596_v22 = vmax.f32 %v520_v17, 0.0  ;;  %v523_v23 = vadd.f32 %v1483_v3, %v522_v21  ;;  %v1249_v24 = vpop.f32.mrb[19].mxu1 }
 0x10c   : > { %v575_v26 = vmax.f32 %v435_v19, 0.0 }
 0x10d   : > { %v597_v27 = vmax.f32 %v523_v23, 0.0 }
 0x10e   : > { %v1060_v28 = vpack.c.bf16 %v575_v26, %v574_v25 }
 0x10f   : > { %v1115_v29 = vpack.c.bf16 %v597_v27, %v596_v22  ;;  %v439_v30 = vpop.f32.mrb[20].mxu0 }
 0x110   : > { %1145 = vst [vmem:[%s1493_s28 + $0x20] sm:$0xff] %v1060_v28   ;;  %v440_v31 = vadd.f32 %v1483_v3, %v439_v30  ;;  %v1208_v32 = vpop.f32.mrb[21].mxu0  ;;  %v527_v33 = vpop.f32.mrb[20].mxu1 }
 0x111   : > { %1156 = vst [vmem:[%s1493_s28 + $0x78] sm:$0xff] %v1115_v29   ;;  %v442_v34 = vpop.f32.mrb[22].mxu0  ;;  %v528_v35 = vadd.f32 %v1483_v3, %v527_v33  ;;  %v1252_v36 = vpop.f32.mrb[21].mxu1 }
 0x112   : > { %v443_v37 = vadd.f32 %v1483_v3, %v442_v34  ;;  %v1209_v38 = vpop.f32.mrb[23].mxu0  ;;  %v530_v39 = vpop.f32.mrb[22].mxu1  ;;  %v576_v43 = vmax.f32 %v440_v31, 0.0 }
 0x113   : > { %v598_v40 = vmax.f32 %v528_v35, 0.0  ;;  %v531_v41 = vadd.f32 %v1483_v3, %v530_v39  ;;  %v1253_v42 = vpop.f32.mrb[23].mxu1 }
 0x114   : > { %v577_v44 = vmax.f32 %v443_v37, 0.0 }
 0x115   : > { %v599_v45 = vmax.f32 %v531_v41, 0.0 }
 0x116   : > { %v1065_v46 = vpack.c.bf16 %v577_v44, %v576_v43 }
 0x117   : > { %v1120_v47 = vpack.c.bf16 %v599_v45, %v598_v40  ;;  %v447_v48 = vpop.f32.mrb[24].mxu0 }
 0x118   : > { %1146 = vst [vmem:[%s1493_s28 + $0x28] sm:$0xff] %v1065_v46   ;;  %v448_v49 = vadd.f32 %v1483_v3, %v447_v48  ;;  %v1212_v50 = vpop.f32.mrb[25].mxu0  ;;  %v535_v51 = vpop.f32.mrb[24].mxu1 }
 0x119   : > { %1157 = vst [vmem:[%s1493_s28 + $0x80] sm:$0xff] %v1120_v47   ;;  %v450_v52 = vpop.f32.mrb[26].mxu0  ;;  %v536_v53 = vadd.f32 %v1483_v3, %v535_v51  ;;  %v1256_v54 = vpop.f32.mrb[25].mxu1 }
 0x11a   : > { %v451_v55 = vadd.f32 %v1483_v3, %v450_v52  ;;  %v1213_v56 = vpop.f32.mrb[27].mxu0  ;;  %v538_v57 = vpop.f32.mrb[26].mxu1  ;;  %v578_v61 = vmax.f32 %v448_v49, 0.0 }
 0x11b   : > { %v600_v58 = vmax.f32 %v536_v53, 0.0  ;;  %v539_v59 = vadd.f32 %v1483_v3, %v538_v57  ;;  %v1257_v60 = vpop.f32.mrb[27].mxu1 }
 0x11c   : > { %v579_v62 = vmax.f32 %v451_v55, 0.0 }
 0x11d   : > { %v601_v63 = vmax.f32 %v539_v59, 0.0 }
 0x11e   : > { %v1070_v0 = vpack.c.bf16 %v579_v62, %v578_v61 }
 0x11f   : > { %v1125_v2 = vpack.c.bf16 %v601_v63, %v600_v58  ;;  %v455_v4 = vpop.f32.mrb[28].mxu0 }
 0x120   : > { %1147 = vst [vmem:[%s1493_s28 + $0x30] sm:$0xff] %v1070_v0   ;;  %v456_v5 = vadd.f32 %v1483_v3, %v455_v4  ;;  %v1216_v6 = vpop.f32.mrb[29].mxu0  ;;  %v543_v7 = vpop.f32.mrb[28].mxu1 }
 0x121   : > { %1158 = vst [vmem:[%s1493_s28 + $0x88] sm:$0xff] %v1125_v2   ;;  %v458_v8 = vpop.f32.mrb[30].mxu0  ;;  %v544_v9 = vadd.f32 %v1483_v3, %v543_v7  ;;  %v1260_v10 = vpop.f32.mrb[29].mxu1 }
 0x122   : > { %v459_v1 = vadd.f32 %v1483_v3, %v458_v8  ;;  %v1217_v11 = vpop.f32.mrb[31].mxu0  ;;  %v546_v12 = vpop.f32.mrb[30].mxu1  ;;  %v580_v16 = vmax.f32 %v456_v5, 0.0 }
 0x123   : > { %v602_v13 = vmax.f32 %v544_v9, 0.0  ;;  %v547_v14 = vadd.f32 %v1483_v3, %v546_v12  ;;  %v1261_v15 = vpop.f32.mrb[31].mxu1 }
 0x124   : > { %v581_v17 = vmax.f32 %v459_v1, 0.0 }
 0x125   : > { %v603_v18 = vmax.f32 %v547_v14, 0.0 }
 0x126   : > { %v1075_v19 = vpack.c.bf16 %v581_v17, %v580_v16 }
 0x127   : > { %v1130_v20 = vpack.c.bf16 %v603_v18, %v602_v13  ;;  %v463_v21 = vpop.f32.mrb[32].mxu0 }
 0x128   : > { %1148 = vst [vmem:[%s1493_s28 + $0x38] sm:$0xff] %v1075_v19   ;;  %v464_v22 = vadd.f32 %v1483_v3, %v463_v21  ;;  %v1220_v23 = vpop.f32.mrb[33].mxu0  ;;  %v551_v24 = vpop.f32.mrb[32].mxu1 }
 0x129   : > { %1159 = vst [vmem:[%s1493_s28 + $0x90] sm:$0xff] %v1130_v20   ;;  %v466_v25 = vpop.f32.mrb[34].mxu0  ;;  %v552_v26 = vadd.f32 %v1483_v3, %v551_v24  ;;  %v1264_v27 = vpop.f32.mrb[33].mxu1 }
 0x12a   : > { %v467_v28 = vadd.f32 %v1483_v3, %v466_v25  ;;  %v1221_v29 = vpop.f32.mrb[35].mxu0  ;;  %v554_v30 = vpop.f32.mrb[34].mxu1  ;;  %v582_v34 = vmax.f32 %v464_v22, 0.0 }
 0x12b   : > { %v604_v31 = vmax.f32 %v552_v26, 0.0  ;;  %v555_v32 = vadd.f32 %v1483_v3, %v554_v30  ;;  %v1265_v33 = vpop.f32.mrb[35].mxu1 }
 0x12c   : > { %v583_v35 = vmax.f32 %v467_v28, 0.0 }
 0x12d   : > { %v605_v36 = vmax.f32 %v555_v32, 0.0 }
 0x12e   : > { %v1080_v37 = vpack.c.bf16 %v583_v35, %v582_v34 }
 0x12f   : > { %v1135_v38 = vpack.c.bf16 %v605_v36, %v604_v31  ;;  %v471_v39 = vpop.f32.mrb[36].mxu0 }
 0x130   : > { %1149 = vst [vmem:[%s1493_s28 + $0x40] sm:$0xff] %v1080_v37   ;;  %v472_v40 = vadd.f32 %v1483_v3, %v471_v39  ;;  %v1224_v41 = vpop.f32.mrb[37].mxu0  ;;  %v559_v42 = vpop.f32.mrb[36].mxu1 }
 0x131   : > { %1160 = vst [vmem:[%s1493_s28 + $0x98] sm:$0xff] %v1135_v38   ;;  %v474_v43 = vpop.f32.mrb[38].mxu0  ;;  %v560_v44 = vadd.f32 %v1483_v3, %v559_v42  ;;  %v1268_v45 = vpop.f32.mrb[37].mxu1 }
 0x132   : > { %v475_v46 = vadd.f32 %v1483_v3, %v474_v43  ;;  %v1225_v47 = vpop.f32.mrb[39].mxu0  ;;  %v562_v48 = vpop.f32.mrb[38].mxu1  ;;  %v584_v52 = vmax.f32 %v472_v40, 0.0 }
 0x133   : > { %v606_v49 = vmax.f32 %v560_v44, 0.0  ;;  %v563_v50 = vadd.f32 %v1483_v3, %v562_v48  ;;  %v1269_v51 = vpop.f32.mrb[39].mxu1 }
 0x134   : > { %v585_v53 = vmax.f32 %v475_v46, 0.0 }
 0x135   : > { %v607_v54 = vmax.f32 %v563_v50, 0.0 }
 0x136   : > { %v1085_v55 = vpack.c.bf16 %v585_v53, %v584_v52 }
 0x137   : > { %v1140_v56 = vpack.c.bf16 %v607_v54, %v606_v49  ;;  %v479_v57 = vpop.f32.mrb[40].mxu0 }
 0x138   : > { %1150 = vst [vmem:[%s1493_s28 + $0x48] sm:$0xff] %v1085_v55   ;;  %v480_v58 = vadd.f32 %v1483_v3, %v479_v57  ;;  %v1228_v59 = vpop.f32.mrb[41].mxu0 }
 0x139   : > { %1161 = vst [vmem:[%s1493_s28 + $0xa0] sm:$0xff] %v1140_v56   ;;  %v482_v60 = vpop.f32.mrb[42].mxu0 }
 0x13a   : > { %v483_v61 = vadd.f32 %v1483_v3, %v482_v60  ;;  %v1229_v62 = vpop.f32.mrb[43].mxu0  ;;  %v586_v63 = vmax.f32 %v480_v58, 0.0 }
 0x13c   : > { %v587_v0 = vmax.f32 %v483_v61, 0.0 }
 0x13e   : > { %v1090_v2 = vpack.c.bf16 %v587_v0, %v586_v63 }
 0x140   : > { %1151 = vst [vmem:[%s1493_s28 + $0x50] sm:$0xff] %v1090_v2  }
 0x141 PF: > { %s13_s14 = sadd.s32 1, %s1320_s14   ;;  %s1567_s12 = smov %s1316_s13 }
 0x142   : > { %p10_p5 = scmp.ge.s32.totalorder %s13_s14, 4   ;;  %s1568_s13 = smov %s1570_s15 }
 0x144   :  { %12 = sbr.rel (!%p10_p5) target bundleno = 2 (0x2), region = 68 }

</bundles_post_ra>
